<compile_context>
chip_gen: v6e
topology: v6e:2x2x1
jax: 0.10.0
libtpu: 0.0.40
codegen_flags: <defaults>
</compile_context>

<pallas_src>
import functools
import math

import jax
import jax.numpy as jnp
from jax import lax
from jax.experimental import pallas as pl
from jax.experimental.pallas import tpu as pltpu


# ----------------------------- parameter init -------------------------------

def init_token_weight(key, vocab_size: int, hidden_size: int, padding_idx=None):
    """nn.Embedding default init: N(0, 1); padding_idx row zeroed."""
    w = jax.random.normal(key, (vocab_size, hidden_size), dtype=jnp.float32)
    if padding_idx is not None:
        w = w.at[padding_idx].set(0.0)
    return w


def init_positional_weight(maxlen: int, hidden_size: int):
    """Matches PositionalEmbedding._init_weight exactly."""
    evens = jnp.arange(0, hidden_size, 2)
    odds = jnp.arange(1, hidden_size, 2)
    even_freq = 10000.0 ** (evens.astype(jnp.float32) / hidden_size)
    odd_freq = 10000.0 ** (odds.astype(jnp.float32) / hidden_size)
    pos = jnp.arange(0, maxlen, dtype=jnp.float32)[:, None]
    w = jnp.zeros((maxlen, hidden_size), dtype=jnp.float32)
    w = w.at[:, evens].set(jnp.sin(pos / even_freq[None, :]))
    w = w.at[:, odds].set(jnp.cos(pos / odd_freq[None, :]))
    return w


def _round_up(x: int, m: int) -> int:
    return ((x + m - 1) // m) * m


# --------------------------------- kernel -----------------------------------

def _embed_gather_kernel(ids_ref, w_hbm_ref, *rest, scale, tokens_per_tile,
                         t_pad, has_pos):
    # ids_ref   : SMEM (B * T_pad,) int32  -- scalar-prefetched, flattened ids
    # w_hbm_ref : (V, H) token table, left in HBM (pl.ANY); DMA'd row by row
    # pos_ref   : (TT, H) f32 positional rows for this T-tile (only if has_pos)
    # out_ref   : (1, TT, H) f32 output block
    # rows_ref  : VMEM (TT, H) scratch for gathered rows
    # sems_ref  : DMA semaphores, one per in-flight row copy
    if has_pos:
        pos_ref, out_ref, rows_ref, sems_ref = rest
    else:
        out_ref, rows_ref, sems_ref = rest
        pos_ref = None

    b = pl.program_id(0)
    t = pl.program_id(1)
    base = b * t_pad + t * tokens_per_tile

    # Issue all row DMAs for this tile (they overlap each other in flight).
    def issue(i, carry):
        idx = ids_ref[base + i]
        pltpu.make_async_copy(w_hbm_ref.at[idx], rows_ref.at[i],
                              sems_ref.at[i]).start()
        return carry

    lax.fori_loop(0, tokens_per_tile, issue, 0)

    # Wait for all row DMAs.
    def wait(i, carry):
        pltpu.make_async_copy(w_hbm_ref.at[0], rows_ref.at[i],
                              sems_ref.at[i]).wait()
        return carry

    lax.fori_loop(0, tokens_per_tile, wait, 0)

    tok = rows_ref[...].astype(jnp.float32)          # (TT, H)
    if has_pos:
        tok = tok + jnp.float32(scale) * pos_ref[...]
    out_ref[...] = tok[None, ...]                    # (1, TT, H)


# -------------------------------- wrapper ------------------------------------

def embedding_forward(X, token_w, pos_w=None, *, maxlen=None,
                      tokens_per_tile=128):
    """Forward of `Embedding` (batch_first=True). X: (B, T) int ids."""
    B, T = X.shape
    V, H = token_w.shape
    has_pos = (maxlen is not None) and (pos_w is not None)
    scale = 1.0 / math.sqrt(H)

    # Token-tile along T: multiple of 8 sublanes, capped for VMEM / semaphores.
    TT = min(int(tokens_per_tile), _round_up(T, 8))
    TT = _round_up(TT, 8)
    T_pad = _round_up(T, TT)
    n_t = T_pad // TT

    # Clamp (guards against OOB DMA) and pad the ids; flatten for SMEM prefetch.
    ids = jnp.clip(X.astype(jnp.int32), 0, V - 1)
    if T_pad != T:
        ids = jnp.pad(ids, ((0, 0), (0, T_pad - T)))
    ids_flat = ids.reshape(B * T_pad)

    in_specs = [pl.BlockSpec(memory_space=pl.ANY)]   # table stays in HBM
    inputs = [token_w]
    if has_pos:
        assert T <= maxlen
        pos_slice = pos_w[:T].astype(jnp.float32)
        if T_pad != T:
            pos_slice = jnp.pad(pos_slice, ((0, T_pad - T), (0, 0)))
        in_specs.append(pl.BlockSpec((TT, H), lambda b, t, ids: (t, 0)))
        inputs.append(pos_slice)

    kernel = functools.partial(_embed_gather_kernel, scale=scale,
                               tokens_per_tile=TT, t_pad=T_pad,
                               has_pos=has_pos)

    block_bytes = TT * H * 4
    vmem_limit = int(min(64 * 2 ** 20, max(16 * 2 ** 20, 8 * block_bytes)))

    out = pl.pallas_call(
        kernel,
        out_shape=jax.ShapeDtypeStruct((B, T_pad, H), jnp.float32),
        grid_spec=pltpu.PrefetchScalarGridSpec(
            num_scalar_prefetch=1,
            grid=(B, n_t),
            in_specs=in_specs,
            out_specs=pl.BlockSpec((1, TT, H), lambda b, t, ids: (b, t, 0)),
            scratch_shapes=[
                pltpu.VMEM((TT, H), token_w.dtype),       # gathered rows
                pltpu.SemaphoreType.DMA((TT,)),           # one sem per row DMA
            ],
        ),
        compiler_params=pltpu.CompilerParams(
            dimension_semantics=("parallel", "parallel"),
            vmem_limit_bytes=vmem_limit,
        ),
    )(ids_flat, *inputs)

    if T_pad != T:
        out = out[:, :T, :]
    return out


# --------------------------------- main --------------------------------------

if __name__ == "__main__":
    # Small, module-consistent shapes.
    vocab_size = 32
    hidden_size = 32
    maxlen = 16
    padding_idx = 0
    B, T = 2, 8

    key = jax.random.PRNGKey(0)
    k_tok, k_ids = jax.random.split(key)

    token_w = init_token_weight(k_tok, vocab_size, hidden_size, padding_idx)
    pos_w = init_positional_weight(maxlen, hidden_size)
    X = jax.random.randint(k_ids, (B, T), 0, vocab_size, dtype=jnp.int32)

    scale = 1.0 / math.sqrt(hidden_size)

    # With positional embedding (maxlen set).
    out = embedding_forward(X, token_w, pos_w, maxlen=maxlen)
    out = jax.block_until_ready(out)
    ref = token_w[X] + scale * pos_w[:T][None, :, :]
    assert out.shape == (B, T, hidden_size)
    assert out.dtype == jnp.float32
    assert jnp.allclose(out, ref, atol=1e-5), "mismatch vs reference (with pos)"

    # Without positional embedding (maxlen=None) — pos input / add omitted.
    out_np = embedding_forward(X, token_w, None, maxlen=None)
    out_np = jax.block_until_ready(out_np)
    assert jnp.allclose(out_np, token_w[X], atol=1e-5), "mismatch vs reference (no pos)"

    print("KERNEL_OK")
</pallas_src>

<mosaic_0001>
module attributes {stable_mosaic.version = 11 : i64} {
  func.func @_embed_gather_kernel(%arg0: i32, %arg1: i32, %arg2: memref<16xi32, #tpu.memory_space<smem>>, %arg3: memref<32x32xf32, #tpu.memory_space<any>>, %arg4: memref<8x32xf32, #tpu.memory_space<vmem>>, %arg5: memref<1x8x32xf32, #tpu.memory_space<vmem>>, %arg6: memref<8x32xf32, #tpu.memory_space<vmem>>, %arg7: memref<8x!tpu.dma_semaphore, #tpu.memory_space<semaphore_mem>>) attributes {dimension_semantics = [#tpu.dimension_semantics<parallel>, #tpu.dimension_semantics<parallel>], iteration_bounds = array<i64: 2, 1>, scalar_prefetch = 1 : i64, scratch_operands = 2 : i64, tpu.core_type = #tpu.core_type<tc>, window_params = [{}, {transform_indices = @transform_1, window_bounds = array<i64: 8, 32>}, {transform_indices = @transform_2, window_bounds = array<i64: 1, 8, 32>}]} {
    %c8_i32 = arith.constant 8 : i32
    %0 = arith.muli %arg0, %c8_i32 : i32
    %c8_i32_0 = arith.constant 8 : i32
    %1 = arith.muli %arg1, %c8_i32_0 : i32
    %2 = arith.addi %0, %1 : i32
    %c0_i32 = arith.constant 0 : i32
    %c8_i32_1 = arith.constant 8 : i32
    %3 = arith.addi %c0_i32, %c8_i32_1 : i32
    %c1_i32 = arith.constant 1 : i32
    scf.for %arg8 = %c0_i32 to %3 step %c1_i32  : i32 {
      %12 = arith.addi %2, %arg8 : i32
      %13 = arith.index_cast %12 : i32 to index
      %14 = memref.load %arg2[%13] : memref<16xi32, #tpu.memory_space<smem>>
      %c0_i32_13 = arith.constant 0 : i32
      %15 = tpu.memref_slice %arg3[%14, %c0_i32_13] : memref<32x32xf32, #tpu.memory_space<any>> -> memref<1x32xf32, #tpu.memory_space<any>>
      %16 = tpu.memref_squeeze %15 : memref<1x32xf32, #tpu.memory_space<any>> -> memref<32xf32, #tpu.memory_space<any>>
      %c0_i32_14 = arith.constant 0 : i32
      %17 = tpu.memref_slice %arg6[%arg8, %c0_i32_14] : memref<8x32xf32, #tpu.memory_space<vmem>> -> memref<1x32xf32, #tpu.memory_space<vmem>>
      %18 = tpu.memref_squeeze %17 : memref<1x32xf32, #tpu.memory_space<vmem>> -> memref<32xf32, #tpu.memory_space<vmem>>
      %19 = tpu.memref_slice %arg7[%arg8] : memref<8x!tpu.dma_semaphore, #tpu.memory_space<semaphore_mem>> -> memref<1x!tpu.dma_semaphore, #tpu.memory_space<semaphore_mem>>
      %20 = tpu.memref_squeeze %19 : memref<1x!tpu.dma_semaphore, #tpu.memory_space<semaphore_mem>> -> memref<!tpu.dma_semaphore, #tpu.memory_space<semaphore_mem>>
      tpu.enqueue_dma source(%16 : memref<32xf32, #tpu.memory_space<any>>) target(%18 : memref<32xf32, #tpu.memory_space<vmem>>) target_semaphore(%20 : memref<!tpu.dma_semaphore, #tpu.memory_space<semaphore_mem>>)
    }
    %c8_i32_2 = arith.constant 8 : i32
    %c0_i32_3 = arith.constant 0 : i32
    %c8_i32_4 = arith.constant 8 : i32
    %4 = arith.addi %c0_i32_3, %c8_i32_4 : i32
    %c1_i32_5 = arith.constant 1 : i32
    scf.for %arg8 = %c0_i32_3 to %4 step %c1_i32_5  : i32 {
      %c0_i32_13 = arith.constant 0 : i32
      %c0_i32_14 = arith.constant 0 : i32
      %12 = tpu.memref_slice %arg3[%c0_i32_13, %c0_i32_14] : memref<32x32xf32, #tpu.memory_space<any>> -> memref<1x32xf32, #tpu.memory_space<any>>
      %13 = tpu.memref_squeeze %12 : memref<1x32xf32, #tpu.memory_space<any>> -> memref<32xf32, #tpu.memory_space<any>>
      %c0_i32_15 = arith.constant 0 : i32
      %14 = tpu.memref_slice %arg6[%arg8, %c0_i32_15] : memref<8x32xf32, #tpu.memory_space<vmem>> -> memref<1x32xf32, #tpu.memory_space<vmem>>
      %15 = tpu.memref_squeeze %14 : memref<1x32xf32, #tpu.memory_space<vmem>> -> memref<32xf32, #tpu.memory_space<vmem>>
      %16 = tpu.memref_slice %arg7[%arg8] : memref<8x!tpu.dma_semaphore, #tpu.memory_space<semaphore_mem>> -> memref<1x!tpu.dma_semaphore, #tpu.memory_space<semaphore_mem>>
      %17 = tpu.memref_squeeze %16 : memref<1x!tpu.dma_semaphore, #tpu.memory_space<semaphore_mem>> -> memref<!tpu.dma_semaphore, #tpu.memory_space<semaphore_mem>>
      tpu.wait_dma2 semaphore(%17 : memref<!tpu.dma_semaphore, #tpu.memory_space<semaphore_mem>>) src(%13 : memref<32xf32, #tpu.memory_space<any>>) dst(%15 : memref<32xf32, #tpu.memory_space<vmem>>)
    }
    %c8_i32_6 = arith.constant 8 : i32
    %c0 = arith.constant 0 : index
    %c0_7 = arith.constant 0 : index
    %5 = vector.load %arg6[%c0, %c0_7] : memref<8x32xf32, #tpu.memory_space<vmem>>, vector<8x32xf32>
    %c0_8 = arith.constant 0 : index
    %c0_9 = arith.constant 0 : index
    %6 = vector.load %arg4[%c0_8, %c0_9] : memref<8x32xf32, #tpu.memory_space<vmem>>, vector<8x32xf32>
    %cst = arith.constant 0.176776692 : f32
    %7 = vector.broadcast %cst : f32 to vector<8x32xf32>
    %8 = arith.mulf %7, %6 : vector<8x32xf32>
    %9 = arith.addf %5, %8 : vector<8x32xf32>
    %10 = vector.shape_cast %9 : vector<8x32xf32> to vector<1x8x32xf32>
    %c0_10 = arith.constant 0 : index
    %c0_11 = arith.constant 0 : index
    %c0_12 = arith.constant 0 : index
    %11 = vector.load %arg5[%c0_10, %c0_11, %c0_12] : memref<1x8x32xf32, #tpu.memory_space<vmem>>, vector<1x8x32xf32>
    tpu.vector_store %arg5[%c0_10, %c0_11, %c0_12], %10 {strides = array<i32>} : memref<1x8x32xf32, #tpu.memory_space<vmem>>, vector<1x8x32xf32>,
    return
  }
  func.func @transform_1(%arg0: i32, %arg1: i32, %arg2: memref<16xi32, #tpu.memory_space<smem>>) -> (i32, i32) {
    %c0_i32 = arith.constant 0 : i32
    %c0_i32_0 = arith.constant 0 : i32
    return %arg1, %c0_i32 : i32, i32
  }
  func.func @transform_2(%arg0: i32, %arg1: i32, %arg2: memref<16xi32, #tpu.memory_space<smem>>) -> (i32, i32, i32) {
    %c0_i32 = arith.constant 0 : i32
    %c0_i32_0 = arith.constant 0 : i32
    return %arg0, %arg1, %c0_i32 : i32, i32, i32
  }
}

</mosaic_0001>

<bundles_post_ra>
// kernel: tpu_custom_call.1
= control target key start
LH: loop header
LB: loop body
LE: loop exit
PB: predicated region body
PF: predicated region fallthrough
CT: control target
= control target key end

     0   :  { %s593_s12 = smov [#allocation5]   ;;  %s769_s0 = inlined_call_operand.hbm [shape: s32[16], index: 0, kind: input, shape index: {}]   ;;  %s770_s1 = inlined_call_operand.hbm [shape: f32[32,32], index: 1, kind: input, shape index: {}]   ;;  %s771_s2 = inlined_call_operand.hbm [shape: f32[8,32], index: 2, kind: input, shape index: {}]   ;;  %s772_s3 = inlined_call_operand.hbm [shape: f32[2,8,32], index: 3, kind: output, shape index: {}]  }
   0x1   :  { %9 = dma.hbm_to_smem %s769_s0, 16, %s593_s12, [#allocation4] }
   0x2   :  { %549 = dma.done.wait [#allocation4], 16 }
   0x3   :  { %550 = vsyncadd [#allocation4], 4294967280 }
   0x4   :  { %11 = sfence }
   0x5   :  { %12 = vsyncpa [#allocation7], 0 }
   0x6   :  { %13 = vsyncpa [#allocation8], 0 }
   0x7   :  { %15 = vsyncpa [#allocation8 + $0x1], 0  ;;  %s620_s15 = smov 0   ;;  %s622_s16 = smov 0  }
   0x8   :  { %s624_s17 = smov 0   ;;  %s626_s18 = smov 0  }
   0x9   :  { %s628_s19 = smov 0   ;;  %s630_s20 = smov 0  }
   0xa LB: > { %s331_s0 = sadd.s32 4294967295, %s583_s20   ;;  %s332_s21 = sadd.s32 4294967294, %s583_s20   ;;  %s583_s20 = sphi %s630_s20, %s21_s20   ;;  %s579_s19 = sphi %s628_s19, %s785_s19   ;;  %s575_s18 = sphi %s626_s18, %s784_s18   ;;  %s571_s17 = sphi %s624_s17, %s783_s17   ;;  %s567_s16 = sphi %s622_s16, %s782_s16   ;;  %s563_s15 = sphi %s620_s15, %s781_s15  }
   0xb   : > { %s33_s22 = sadd.s32 1, %s579_s19  ;;  %s68_s23 = sadd.s32 1, %s571_s17 }
   0xc   : > { %p35_p0 = scmp.ge.s32.totalorder %s33_s22, 2  ;;  %p78_p1 = scmp.ne.s32.totalorder %s571_s17, %s567_s16 }
   0xd   : > { %p79_p2 = scmp.eq.s32.totalorder %s331_s0, 1  ;;  %p84_p3 = scmp.ne.s32.totalorder %s567_s16, %s563_s15 }
   0xe   : > { %s787_s22 = smov (%p35_p0, %s33_s22), 0  ;;  %p85_p5 = scmp.eq.s32.totalorder %s332_s21, 1 }
   0xf   : > { %p660_p4 = por %p79_p2, %p78_p1  ;;  %s63_s25 = ssub.s32 %s579_s19, %s787_s22 }
  0x10   : > { %p333_p6 = scmp.ge.s32.totalorder %s583_s20, 1  ;;  %p66_p7 = scmp.eq.s32.totalorder %s63_s25, 0 }
  0x11   : > { %p667_p8 = por %p85_p5, %p84_p3  ;;  %p92_p9 = scmp.lt.s32.totalorder %s583_s20, 3 }
  0x12   : > { %s673_s27 = scalar_select %p66_p7, %s571_s17, %s68_s23  }
  0x13   : > { %p675_p10 = pnand %p333_p6, %p92_p9  ;;  %p679_p11 = scmp.eq.s32.totalorder %s331_s0, 0 }
  0x14   : > { %s594_s30 = smov [#allocation6]  }
  0x15   : > { %p358_p12 = pneg %p675_p10  ;;  %s107_s4 = sshll.u32 %s594_s30, 4  ;;  %s108_s4 = int_to_ptr.vmem [resolvable:$true] %s107_s4 }
  0x16   : > { %s454_s5 = scalar_lea.vmem %s108_s4, 128  ;;  %p462_p5 = scmp.lt.s32.totalorder %s108_s4, %s108_s4 }
  0x17   : > { %p359_p13 = pnand %p679_p11, %p358_p12  ;;  %p455_p1 = scmp.ne.s32.totalorder %s108_s4, %s454_s5 }
  0x18   : > { %p463_p6 = scmp.lt.s32.totalorder %s454_s5, %s454_s5 }
  0x19   : > { %p445_p0 = pneg %p359_p13 }
  0x1a   : > { %p464_p7 = por %p463_p6, %p462_p5 }
  0x1b   : > { %p457_p2 = pnand %p455_p1, %p445_p0 }
  0x1d   : > { %p458_p3 = pneg %p457_p2 }
  0x1f   : > { %p465_p9 = pnand %p464_p7, %p458_p3 }
  0x21   : > { %468 = shalt.err (!%p465_p9)
}
  0x22   : > { %361 = dma.hbm_to_vmem [thread:$0]  (!%p359_p13), %s771_s2, 128, %s108_s4, [#allocation7]  }
  0x23   : > { %120 = sbr.rel (%p675_p10) target bundleno = 109 (0x6d), region = 24 }
  0x28   : > { %552 = dma.done.wait (%p679_p11), [#allocation7], 128  }
  0x29   : > { %554 = vsyncadd (%p679_p11), [#allocation7], 4294967168  ;;  %s773_s8 = sand.u32 1, %s567_s16   ;;  %s338_s9 = sshll.u32 %s575_s18, 3 }
  0x2a   : > { %s700_s10 = sshll.u32 %s773_s8, 3  ;;  %s703_s12 = smov 0  }
  0x2b LB: >> { %s144_s13 = sadd.s32 %s587_s12, %s338_s9  ;;  %s148_s0 = scalar_lea.vmem [#allocation2], %s587_s12  ;;  %s587_s12 = sphi %s703_s12, %s143_s12  }
  0x2c   : >> { %s145_s14 = sld [smem:[#allocation5 + %s144_s13]]  ;;  %s157_s21 = sshll.u32 %s148_s0, 4  ;;  %s158_s21 = int_to_ptr.vmem [resolvable:$true] %s157_s21 }
  0x2d   : >> { %s149_s30 = scalar_lea.sflag [#allocation3], %s587_s12  ;;  %s471_s7 = scalar_lea.hbm %s770_s1, 512 }
  0x32   : >> { %s339_s23 = sshll.u32 %s145_s14, 4 }
  0x33   : >> { %s147_s29 = scalar_lea.hbm %s770_s1, %s339_s23 }
  0x34   : >> { %s469_s4 = scalar_lea.hbm %s147_s29, 16  ;;  %p472_p11 = scmp.lt.s32.totalorder %s147_s29, %s770_s1 }
  0x35   : >> { %p470_p10 = scmp.ne.s32.totalorder %s147_s29, %s469_s4  ;;  %p473_p12 = scmp.lt.s32.totalorder %s471_s7, %s469_s4 }
  0x37   : >> { %p474_p13 = por %p473_p12, %p472_p11 }
  0x39   : >> { %p475_p0 = pnand %p474_p13, %p470_p10 }
  0x3b   : >> { %478 = shalt.err (!%p475_p0)  }
  0x3c   : >> { %s479_s13 = scalar_lea.vmem %s158_s21, 16  ;;  %s595_s14 = smov [#allocation2]  }
  0x3d   : >> { %p480_p1 = scmp.ne.s32.totalorder %s158_s21, %s479_s13  ;;  %s481_s0 = sshll.u32 %s595_s14, 4  ;;  %s482_s0 = int_to_ptr.vmem [resolvable:$false] %s481_s0 }
  0x3e   : >> { %s483_s23 = scalar_lea.vmem %s482_s0, 128  ;;  %p484_p2 = scmp.lt.s32.totalorder %s158_s21, %s482_s0 }
  0x3f   : >> { %p485_p3 = scmp.lt.s32.totalorder %s483_s23, %s479_s13 }
  0x41   : >> { %p486_p5 = por %p485_p3, %p484_p2 }
  0x43   : >> { %p487_p6 = pnand %p486_p5, %p480_p1 }
  0x45   : >> { %490 = shalt.err (!%p487_p6)  }
  0x46   : >> { %160 = dma.hbm_to_vmem [thread:$0]  %s147_s29, 16, %s158_s21, %s149_s30 }
  0x47   : >> { %s143_s12 = sadd.s32 1, %s587_s12  }
  0x48   : >> { %p140_p7 = scmp.ge.s32.totalorder %s143_s12, 8  }
  0x49   : > { %s589_s8 = smov (%p140_p7), 0  }
  0x4a   : > { %142 = sbr.rel (!%p140_p7) target bundleno = 43 (0x2b), region = 91 }
  0x4f LB: >> { %s167_s11 = scalar_lea.sflag [#allocation3], %s591_s8  ;;  %s591_s8 = sphi %s589_s8, %s166_s8  }
  0x50   : >> { %555 = dma.done.wait %s167_s11, 16 }
  0x51   : >> { %556 = vsyncadd %s167_s11, 4294967280  ;;  %s166_s8 = sadd.s32 1, %s591_s8  }
  0x52   : >> { %p163_p9 = scmp.ge.s32.totalorder %s166_s8, 8  }
  0x53   : > { %v170_v0 = vld [vmem:[#allocation2] sm:$0xff] (%p163_p9)  ;;  %v171_v1 = vld [vmem:[#allocation6] sm:$0xff] (%p163_p9)  ;;  %s341_s12 = sshll.u32 (%p163_p9), %s575_s18, 7  ;;  %s778_s9 = scalar_lea.vmem (%p163_p9), [#allocation9], %s700_s10  ;;  %vm174_vm0 = vcmask (%p163_p9), 261120  }
  0x54   : > { %165 = sbr.rel (!%p163_p9) target bundleno = 79 (0x4f), region = 102  ;;  %v172_v2 = vmul.f32 (%p163_p9), 0.17677669, %v171_v1  ;;  %s191_s21 = sshll.u32 (%p163_p9), %s778_s9, 4  ;;  %s192_s21 = int_to_ptr.vmem [resolvable:$true] %s191_s21 }
  0x55   : > { %s189_s29 = scalar_lea.hbm (%p163_p9), %s772_s3, %s341_s12  ;;  %s779_s30 = smov (%p163_p9), %s778_s9 }
  0x56   : > { %v173_v3 = vadd.f32 (%p163_p9), %v172_v2, %v170_v0  ;;  %s780_s4 = sand.u32 (%p163_p9), 1, %s567_s16   ;;  %s491_s6 = scalar_lea.vmem (%p163_p9), %s192_s21, 128 }
  0x57   : > { %s177_s5 = scalar_lea.sflag (%p163_p9), [#allocation8], %s780_s4  ;;  %p492_p10 = scmp.ne.s32.totalorder (%p163_p9), %s192_s21, %s491_s6 }
  0x58   : > { %175 = vst.msk [vmem:[%s779_s30] sm:$0xff] (%p163_p9), %vm174_vm0, %v173_v3  ;;  %s596_s18 = smov (%p163_p9), [#allocation9]  }
  0x59   : > { %p493_p11 = pnand %p492_p10, %p660_p4  ;;  %s495_s7 = sshll.u32 %s596_s18, 4  ;;  %s496_s7 = int_to_ptr.vmem [resolvable:$false] %s495_s7 }
  0x5a   : > { %s497_s13 = scalar_lea.vmem %s496_s7, 256  ;;  %p498_p13 = scmp.lt.s32.totalorder %s192_s21, %s496_s7 }
  0x5b   : > { %p494_p12 = pneg %p493_p11  ;;  %p499_p0 = scmp.lt.s32.totalorder %s497_s13, %s491_s6 }
  0x5d   : > { %p500_p1 = por %p499_p0, %p498_p13 }
  0x5f   : > { %p501_p2 = pnand %p500_p1, %p494_p12 }
  0x61   : > { %504 = shalt.err (!%p501_p2)
}
  0x62   : > { %s505_s14 = scalar_lea.hbm %s189_s29, 128  ;;  %s509_s23 = scalar_lea.hbm %s772_s3, 256 }
  0x63   : > { %p506_p3 = scmp.ne.s32.totalorder %s189_s29, %s505_s14  ;;  %p510_p7 = scmp.lt.s32.totalorder %s189_s29, %s772_s3 }
  0x64   : > { %p511_p9 = scmp.lt.s32.totalorder %s509_s23, %s505_s14 }
  0x65   : > { %p507_p5 = pnand %p506_p3, %p660_p4 }
  0x66   : > { %p512_p10 = por %p511_p9, %p510_p7 }
  0x67   : > { %p508_p6 = pneg %p507_p5 }
  0x69   : > { %p513_p11 = pnand %p512_p10, %p508_p6 }
  0x6b   : > { %516 = shalt.err (!%p513_p11)
}
  0x6c   : > { %356 = dma.vmem_to_hbm [thread:$0]  (%p660_p4), %s192_s21, 128, %s189_s29, %s177_s5  }
  0x6d PF: > { %p368_p12 = scmp.ge.s32.totalorder %s583_s20, 2  ;;  %s203_s12 = sand.u32 1, %s563_s15  }
  0x6e   : > { %s204_s9 = scalar_lea.sflag [#allocation8], %s203_s12 }
  0x6f   : > { %p363_p13 = pnand %p368_p12, %p667_p8 }
  0x71   : > { %p364_p0 = pneg %p363_p13 }
  0x73   : > { %558 = dma.done.wait (%p364_p0), %s204_s9, 128  }
  0x74   : > { %560 = vsyncadd (%p364_p0), %s204_s9, 4294967168  ;;  %s21_s20 = sadd.s32 1, %s583_s20   ;;  %s781_s15 = smov %s567_s16 }
  0x75   : > { %p18_p1 = scmp.ge.s32.totalorder %s21_s20, 4   ;;  %s782_s16 = smov %s571_s17 }
  0x76   : > { %s783_s17 = smov %s673_s27  ;;  %s784_s18 = smov %s579_s19 }
  0x77   : > { %s785_s19 = smov %s787_s22  ;;  %20 = sbr.rel (!%p18_p1) target bundleno = 10 (0xa), region = 113 }
  0x7c   :  { %209 = vsyncpa [#allocation7], 1 }
  0x7d   :  { %211 = vsyncpa [#allocation7 + $0x1], 1 }
  0x7e   :  { %212 = vsyncpa [#allocation8], 1 }
  0x7f   :  { %214 = vsyncpa [#allocation8 + $0x1], 1 }
  0x80   :  { %215 = vsyncmov [#allocation3] }
  0x83   :  { %s216_s24 = vpop.sfrf %215 }
  0x84   :  { %p344_p4 = scmp.ne.s32.totalorder %s216_s24, 0 }
  0x86   :  { %220 = shalt.err (%p344_p4)  }
  0x87   :  { %222 = vsyncmov [#allocation3 + $0x1] }
  0x8a   :  { %s223_s26 = vpop.sfrf %222 }
  0x8b   :  { %p345_p8 = scmp.ne.s32.totalorder %s223_s26, 0 }
  0x8d   :  { %227 = shalt.err (%p345_p8)  }
  0x8e   :  { %229 = vsyncmov [#allocation3 + $0x2] }
  0x91   :  { %s230_s27 = vpop.sfrf %229 }
  0x92   :  { %p346_p2 = scmp.ne.s32.totalorder %s230_s27, 0 }
  0x94   :  { %234 = shalt.err (%p346_p2)  }
  0x95   :  { %236 = vsyncmov [#allocation3 + $0x3] }
  0x98   :  { %s237_s22 = vpop.sfrf %236 }
  0x99   :  { %p347_p3 = scmp.ne.s32.totalorder %s237_s22, 0 }
  0x9b   :  { %241 = shalt.err (%p347_p3)  }
  0x9c   :  { %243 = vsyncmov [#allocation3 + $0x4] }
  0x9f   :  { %s244_s1 = vpop.sfrf %243 }
  0xa0   :  { %p348_p5 = scmp.ne.s32.totalorder %s244_s1, 0 }
  0xa2   :  { %248 = shalt.err (%p348_p5)  }
  0xa3   :  { %250 = vsyncmov [#allocation3 + $0x5] }
  0xa6   :  { %s251_s2 = vpop.sfrf %250 }
  0xa7   :  { %p349_p6 = scmp.ne.s32.totalorder %s251_s2, 0 }
  0xa9   :  { %255 = shalt.err (%p349_p6)  }
  0xaa   :  { %257 = vsyncmov [#allocation3 + $0x6] }
  0xad   :  { %s258_s3 = vpop.sfrf %257 }
  0xae   :  { %p350_p7 = scmp.ne.s32.totalorder %s258_s3, 0 }
  0xb0   :  { %262 = shalt.err (%p350_p7)  }
  0xb1   :  { %264 = vsyncmov [#allocation3 + $0x7] }
  0xb4   :  { %s265_s15 = vpop.sfrf %264 }
  0xb5   :  { %p351_p9 = scmp.ne.s32.totalorder %s265_s15, 0 }
  0xb7   :  { %269 = shalt.err (%p351_p9)  }

</bundles_post_ra>
